<compile_context>
chip_gen: v7x
topology: tpu7x:2x2x1
jax: 0.10.0
libtpu: 0.0.40
codegen_flags: <defaults>
</compile_context>

<pallas_src>
import jax
import jax.numpy as jnp
from jax.experimental import pallas as pl
from jax.experimental.pallas import tpu as pltpu


# ------------------------- Pallas kernel ---------------------------------

def spectral_mul(x_r, x_i, w_r, w_i, *, B, Cin, Cout, mode_tile=None):
    """Fused complex spectral multiply: out[b,o,m] = sum_i x[b,i,m]*w[i,o,m].

    x_r, x_i : (B*Cin,   Mtot) float32   rows ordered b-major (row = b*Cin + i)
    w_r, w_i : (Cin*Cout, Mtot) float32  rows ordered i-major (row = i*Cout + o)
    Returns (o_r, o_i) each (B*Cout, Mtot) float32 (row = b*Cout + o).
    """
    Mtot = x_r.shape[-1]
    if mode_tile is None:
        # Single grid step for small problems (no exposed first-tile DMA /
        # per-step overhead); 128-wide lane tiles (>=4 steps, even count for
        # v7x's two TensorCores) once the mode axis is large.
        mode_tile = Mtot if Mtot <= 512 else 128
    assert Mtot % mode_tile == 0
    assert mode_tile == Mtot or mode_tile % 128 == 0
    grid = (Mtot // mode_tile,)

    def kernel(xr_ref, xi_ref, wr_ref, wi_ref, or_ref, oi_ref):
        # NOTE: for production sizes (B=32, Cin/Cout=64) batch should move to
        # the grid and Cout be tiled in 8-sublane chunks; at demo sizes the
        # collapsed (B*Cin / B*Cout, Mt) layout keeps sublanes full.
        for b in range(B):
            acc_r = jnp.zeros((Cout, mode_tile), jnp.float32)
            acc_i = jnp.zeros((Cout, mode_tile), jnp.float32)

            def contrib(i, acc_r, acc_i):
                ar = xr_ref[pl.ds(b * Cin + i, 1), :]        # (1, Mt)
                ai = xi_ref[pl.ds(b * Cin + i, 1), :]
                wr = wr_ref[pl.ds(i * Cout, Cout), :]        # (Cout, Mt)
                wi = wi_ref[pl.ds(i * Cout, Cout), :]
                # Plain 4-mult complex product (mul/add share VALU slots;
                # the 3-mult trick only pays off on the MXU).
                acc_r = acc_r + (ar * wr - ai * wi)
                acc_i = acc_i + (ar * wi + ai * wr)
                return acc_r, acc_i

            if Cin <= 8:
                # Small channel count: full static unroll.
                for i in range(Cin):
                    acc_r, acc_i = contrib(i, acc_r, acc_i)
            else:
                # Realistic FNO widths: bounded live ranges via fori_loop.
                def body(i, carry):
                    return contrib(i, *carry)
                acc_r, acc_i = jax.lax.fori_loop(0, Cin, body, (acc_r, acc_i))

            or_ref[pl.ds(b * Cout, Cout), :] = acc_r
            oi_ref[pl.ds(b * Cout, Cout), :] = acc_i

    x_spec = pl.BlockSpec((B * Cin, mode_tile), lambda m: (0, m))
    w_spec = pl.BlockSpec((Cin * Cout, mode_tile), lambda m: (0, m))
    o_spec = pl.BlockSpec((B * Cout, mode_tile), lambda m: (0, m))

    # VMEM budget derived from actual block bytes (double-buffered) with
    # headroom; capped at 48 MiB so the config also fits v7x's 64 MiB VMEM.
    block_bytes = 4 * mode_tile * 2 * (B * Cin + Cin * Cout + B * Cout)
    vmem_limit = int(min(48 << 20, max(16 << 20, 4 * block_bytes)))

    return pl.pallas_call(
        kernel,
        out_shape=(
            jax.ShapeDtypeStruct((B * Cout, Mtot), jnp.float32),
            jax.ShapeDtypeStruct((B * Cout, Mtot), jnp.float32),
        ),
        grid_spec=pltpu.PrefetchScalarGridSpec(
            num_scalar_prefetch=0,
            grid=grid,
            in_specs=[x_spec, x_spec, w_spec, w_spec],
            out_specs=(o_spec, o_spec),
        ),
        compiler_params=pltpu.CompilerParams(
            dimension_semantics=("parallel",),
            vmem_limit_bytes=vmem_limit,
        ),
    )(x_r, x_i, w_r, w_i)


# ------------------------- Module wrapper ---------------------------------

def _round_up(n, k):
    return ((n + k - 1) // k) * k


def make_spectral_conv2d(w1_r, w1_i, w2_r, w2_i, modes1, modes2):
    """Builds the forward pass of SpectralConv2d.

    Weights are packed/padded ONCE here (init time), not per forward call:
    both corners are concatenated along the flattened mode axis and padded
    to a lane-dense multiple of 128.
    """
    Cin, Cout = w1_r.shape[0], w1_r.shape[1]
    M = modes1 * modes2
    Mtot = _round_up(2 * M, 128)            # concat-then-pad: 288 -> 384

    def pack_w(wa, wb):                     # (Cin,Cout,m1,m2) x2 -> (Cin*Cout, Mtot)
        z = jnp.concatenate(
            [wa.reshape(Cin, Cout, M), wb.reshape(Cin, Cout, M)], axis=-1
        ).reshape(Cin * Cout, 2 * M).astype(jnp.float32)
        buf = jnp.zeros((Cin * Cout, Mtot), jnp.float32)
        return buf.at[:, :2 * M].set(z)

    w_r = pack_w(w1_r, w2_r)
    w_i = pack_w(w1_i, w2_i)

    def forward(x):
        B, _, H, W = x.shape
        Wh = W // 2 + 1

        # TODO(synk): rfft2 / irfft2 have no Pallas equivalent; kept in plain JAX.
        x_ft = jnp.fft.rfft2(x)                                   # (B,Cin,H,Wh) c64

        # Gather the two retained corners, concat along modes, pad once.
        top = x_ft[:, :, :modes1, :modes2].reshape(B, Cin, M)
        bot = x_ft[:, :, H - modes1:, :modes2].reshape(B, Cin, M)
        corners = jnp.concatenate([top, bot], axis=-1).reshape(B * Cin, 2 * M)

        x_r = jnp.zeros((B * Cin, Mtot), jnp.float32).at[:, :2 * M].set(
            jnp.real(corners).astype(jnp.float32))
        x_i = jnp.zeros((B * Cin, Mtot), jnp.float32).at[:, :2 * M].set(
            jnp.imag(corners).astype(jnp.float32))

        # Single fused Pallas launch for both corner contractions.
        o_r, o_i = spectral_mul(x_r, x_i, w_r, w_i, B=B, Cin=Cin, Cout=Cout)

        o1 = (o_r[:, :M] + 1j * o_i[:, :M]).astype(jnp.complex64)
        o2 = (o_r[:, M:2 * M] + 1j * o_i[:, M:2 * M]).astype(jnp.complex64)
        o1 = o1.reshape(B, Cout, modes1, modes2)
        o2 = o2.reshape(B, Cout, modes1, modes2)

        # Scatter back into the full spectrum and invert.
        out_ft = jnp.zeros((B, Cout, H, Wh), dtype=jnp.complex64)
        out_ft = out_ft.at[:, :, :modes1, :modes2].set(o1)
        out_ft = out_ft.at[:, :, H - modes1:, :modes2].set(o2)

        return jnp.fft.irfft2(out_ft, s=(H, W)).astype(jnp.float32)

    return forward


# ------------------------- Demo -------------------------------------------

if __name__ == "__main__":
    # Module constants (matching the reference file): modes1 = modes2 = 12, N = 32
    modes1 = 12
    modes2 = 12
    N = 32

    B, Cin, Cout, H, W = 2, 4, 4, N, N

    key = jax.random.PRNGKey(0)
    k_x, k_w1r, k_w1i, k_w2r, k_w2i = jax.random.split(key, 5)

    x = jax.random.normal(k_x, (B, Cin, H, W), dtype=jnp.float32)

    # weights = scale * torch.rand(..., dtype=cfloat): uniform [0,1) real & imag
    scale = 1.0 / (Cin * Cout)
    w1_r = scale * jax.random.uniform(k_w1r, (Cin, Cout, modes1, modes2), dtype=jnp.float32)
    w1_i = scale * jax.random.uniform(k_w1i, (Cin, Cout, modes1, modes2), dtype=jnp.float32)
    w2_r = scale * jax.random.uniform(k_w2r, (Cin, Cout, modes1, modes2), dtype=jnp.float32)
    w2_i = scale * jax.random.uniform(k_w2i, (Cin, Cout, modes1, modes2), dtype=jnp.float32)

    # Weights packed once at construction time (outside the per-call jit path).
    spectral_conv = make_spectral_conv2d(w1_r, w1_i, w2_r, w2_i, modes1, modes2)
    fwd = jax.jit(spectral_conv)
    y = fwd(x)
    jax.block_until_ready(y)

    # Sanity: pure-JAX reference of the same math.
    x_ft = jnp.fft.rfft2(x)
    w1 = (w1_r + 1j * w1_i).astype(jnp.complex64)
    w2 = (w2_r + 1j * w2_i).astype(jnp.complex64)
    out_ft = jnp.zeros((B, Cout, H, W // 2 + 1), dtype=jnp.complex64)
    out_ft = out_ft.at[:, :, :modes1, :modes2].set(
        jnp.einsum('bixy,ioxy->boxy', x_ft[:, :, :modes1, :modes2], w1))
    out_ft = out_ft.at[:, :, -modes1:, :modes2].set(
        jnp.einsum('bixy,ioxy->boxy', x_ft[:, :, -modes1:, :modes2], w2))
    y_ref = jnp.fft.irfft2(out_ft, s=(H, W)).astype(jnp.float32)

    assert y.shape == (B, Cout, H, W)
    assert jnp.allclose(y, y_ref, atol=1e-4, rtol=1e-4), "mismatch vs reference"
    print("KERNEL_OK")
</pallas_src>

<mosaic_0001>
module attributes {stable_mosaic.version = 11 : i64} {
  func.func @kernel(%arg0: i32, %arg1: memref<8x384xf32, #tpu.memory_space<vmem>>, %arg2: memref<8x384xf32, #tpu.memory_space<vmem>>, %arg3: memref<16x384xf32, #tpu.memory_space<vmem>>, %arg4: memref<16x384xf32, #tpu.memory_space<vmem>>, %arg5: memref<8x384xf32, #tpu.memory_space<vmem>>, %arg6: memref<8x384xf32, #tpu.memory_space<vmem>>) attributes {dimension_semantics = [#tpu.dimension_semantics<parallel>], iteration_bounds = array<i64: 1>, scalar_prefetch = 0 : i64, scratch_operands = 0 : i64, tpu.core_type = #tpu.core_type<tc>, window_params = [{transform_indices = @transform_0, window_bounds = array<i64: 8, 384>}, {transform_indices = @transform_1, window_bounds = array<i64: 8, 384>}, {transform_indices = @transform_2, window_bounds = array<i64: 16, 384>}, {transform_indices = @transform_3, window_bounds = array<i64: 16, 384>}, {transform_indices = @transform_4, window_bounds = array<i64: 8, 384>}, {transform_indices = @transform_5, window_bounds = array<i64: 8, 384>}]} {
    %cst = arith.constant 0.000000e+00 : f32
    %0 = vector.broadcast %cst : f32 to vector<4x384xf32>
    %cst_0 = arith.constant 0.000000e+00 : f32
    %1 = vector.broadcast %cst_0 : f32 to vector<4x384xf32>
    %c0 = arith.constant 0 : index
    %c0_1 = arith.constant 0 : index
    %2 = vector.load %arg1[%c0, %c0_1] : memref<8x384xf32, #tpu.memory_space<vmem>>, vector<1x384xf32>
    %c0_2 = arith.constant 0 : index
    %c0_3 = arith.constant 0 : index
    %3 = vector.load %arg2[%c0_2, %c0_3] : memref<8x384xf32, #tpu.memory_space<vmem>>, vector<1x384xf32>
    %c0_4 = arith.constant 0 : index
    %c0_5 = arith.constant 0 : index
    %4 = vector.load %arg3[%c0_4, %c0_5] : memref<16x384xf32, #tpu.memory_space<vmem>>, vector<4x384xf32>
    %c0_6 = arith.constant 0 : index
    %c0_7 = arith.constant 0 : index
    %5 = vector.load %arg4[%c0_6, %c0_7] : memref<16x384xf32, #tpu.memory_space<vmem>>, vector<4x384xf32>
    %6 = vector.broadcast %2 : vector<1x384xf32> to vector<4x384xf32>
    %7 = arith.mulf %6, %4 : vector<4x384xf32>
    %8 = vector.broadcast %3 : vector<1x384xf32> to vector<4x384xf32>
    %9 = arith.mulf %8, %5 : vector<4x384xf32>
    %10 = arith.subf %7, %9 : vector<4x384xf32>
    %11 = arith.addf %0, %10 : vector<4x384xf32>
    %12 = vector.broadcast %2 : vector<1x384xf32> to vector<4x384xf32>
    %13 = arith.mulf %12, %5 : vector<4x384xf32>
    %14 = vector.broadcast %3 : vector<1x384xf32> to vector<4x384xf32>
    %15 = arith.mulf %14, %4 : vector<4x384xf32>
    %16 = arith.addf %13, %15 : vector<4x384xf32>
    %17 = arith.addf %1, %16 : vector<4x384xf32>
    %c1 = arith.constant 1 : index
    %c0_8 = arith.constant 0 : index
    %18 = vector.load %arg1[%c1, %c0_8] : memref<8x384xf32, #tpu.memory_space<vmem>>, vector<1x384xf32>
    %c1_9 = arith.constant 1 : index
    %c0_10 = arith.constant 0 : index
    %19 = vector.load %arg2[%c1_9, %c0_10] : memref<8x384xf32, #tpu.memory_space<vmem>>, vector<1x384xf32>
    %c4 = arith.constant 4 : index
    %c0_11 = arith.constant 0 : index
    %20 = vector.load %arg3[%c4, %c0_11] : memref<16x384xf32, #tpu.memory_space<vmem>>, vector<4x384xf32>
    %c4_12 = arith.constant 4 : index
    %c0_13 = arith.constant 0 : index
    %21 = vector.load %arg4[%c4_12, %c0_13] : memref<16x384xf32, #tpu.memory_space<vmem>>, vector<4x384xf32>
    %22 = vector.broadcast %18 : vector<1x384xf32> to vector<4x384xf32>
    %23 = arith.mulf %22, %20 : vector<4x384xf32>
    %24 = vector.broadcast %19 : vector<1x384xf32> to vector<4x384xf32>
    %25 = arith.mulf %24, %21 : vector<4x384xf32>
    %26 = arith.subf %23, %25 : vector<4x384xf32>
    %27 = arith.addf %11, %26 : vector<4x384xf32>
    %28 = vector.broadcast %18 : vector<1x384xf32> to vector<4x384xf32>
    %29 = arith.mulf %28, %21 : vector<4x384xf32>
    %30 = vector.broadcast %19 : vector<1x384xf32> to vector<4x384xf32>
    %31 = arith.mulf %30, %20 : vector<4x384xf32>
    %32 = arith.addf %29, %31 : vector<4x384xf32>
    %33 = arith.addf %17, %32 : vector<4x384xf32>
    %c2 = arith.constant 2 : index
    %c0_14 = arith.constant 0 : index
    %34 = vector.load %arg1[%c2, %c0_14] : memref<8x384xf32, #tpu.memory_space<vmem>>, vector<1x384xf32>
    %c2_15 = arith.constant 2 : index
    %c0_16 = arith.constant 0 : index
    %35 = vector.load %arg2[%c2_15, %c0_16] : memref<8x384xf32, #tpu.memory_space<vmem>>, vector<1x384xf32>
    %c8 = arith.constant 8 : index
    %c0_17 = arith.constant 0 : index
    %36 = vector.load %arg3[%c8, %c0_17] : memref<16x384xf32, #tpu.memory_space<vmem>>, vector<4x384xf32>
    %c8_18 = arith.constant 8 : index
    %c0_19 = arith.constant 0 : index
    %37 = vector.load %arg4[%c8_18, %c0_19] : memref<16x384xf32, #tpu.memory_space<vmem>>, vector<4x384xf32>
    %38 = vector.broadcast %34 : vector<1x384xf32> to vector<4x384xf32>
    %39 = arith.mulf %38, %36 : vector<4x384xf32>
    %40 = vector.broadcast %35 : vector<1x384xf32> to vector<4x384xf32>
    %41 = arith.mulf %40, %37 : vector<4x384xf32>
    %42 = arith.subf %39, %41 : vector<4x384xf32>
    %43 = arith.addf %27, %42 : vector<4x384xf32>
    %44 = vector.broadcast %34 : vector<1x384xf32> to vector<4x384xf32>
    %45 = arith.mulf %44, %37 : vector<4x384xf32>
    %46 = vector.broadcast %35 : vector<1x384xf32> to vector<4x384xf32>
    %47 = arith.mulf %46, %36 : vector<4x384xf32>
    %48 = arith.addf %45, %47 : vector<4x384xf32>
    %49 = arith.addf %33, %48 : vector<4x384xf32>
    %c3 = arith.constant 3 : index
    %c0_20 = arith.constant 0 : index
    %50 = vector.load %arg1[%c3, %c0_20] : memref<8x384xf32, #tpu.memory_space<vmem>>, vector<1x384xf32>
    %c3_21 = arith.constant 3 : index
    %c0_22 = arith.constant 0 : index
    %51 = vector.load %arg2[%c3_21, %c0_22] : memref<8x384xf32, #tpu.memory_space<vmem>>, vector<1x384xf32>
    %c12 = arith.constant 12 : index
    %c0_23 = arith.constant 0 : index
    %52 = vector.load %arg3[%c12, %c0_23] : memref<16x384xf32, #tpu.memory_space<vmem>>, vector<4x384xf32>
    %c12_24 = arith.constant 12 : index
    %c0_25 = arith.constant 0 : index
    %53 = vector.load %arg4[%c12_24, %c0_25] : memref<16x384xf32, #tpu.memory_space<vmem>>, vector<4x384xf32>
    %54 = vector.broadcast %50 : vector<1x384xf32> to vector<4x384xf32>
    %55 = arith.mulf %54, %52 : vector<4x384xf32>
    %56 = vector.broadcast %51 : vector<1x384xf32> to vector<4x384xf32>
    %57 = arith.mulf %56, %53 : vector<4x384xf32>
    %58 = arith.subf %55, %57 : vector<4x384xf32>
    %59 = arith.addf %43, %58 : vector<4x384xf32>
    %60 = vector.broadcast %50 : vector<1x384xf32> to vector<4x384xf32>
    %61 = arith.mulf %60, %53 : vector<4x384xf32>
    %62 = vector.broadcast %51 : vector<1x384xf32> to vector<4x384xf32>
    %63 = arith.mulf %62, %52 : vector<4x384xf32>
    %64 = arith.addf %61, %63 : vector<4x384xf32>
    %65 = arith.addf %49, %64 : vector<4x384xf32>
    %c0_26 = arith.constant 0 : index
    %c0_27 = arith.constant 0 : index
    %66 = vector.load %arg5[%c0_26, %c0_27] : memref<8x384xf32, #tpu.memory_space<vmem>>, vector<4x384xf32>
    tpu.vector_store %arg5[%c0_26, %c0_27], %59 {strides = array<i32>} : memref<8x384xf32, #tpu.memory_space<vmem>>, vector<4x384xf32>,
    %c0_28 = arith.constant 0 : index
    %c0_29 = arith.constant 0 : index
    %67 = vector.load %arg6[%c0_28, %c0_29] : memref<8x384xf32, #tpu.memory_space<vmem>>, vector<4x384xf32>
    tpu.vector_store %arg6[%c0_28, %c0_29], %65 {strides = array<i32>} : memref<8x384xf32, #tpu.memory_space<vmem>>, vector<4x384xf32>,
    %cst_30 = arith.constant 0.000000e+00 : f32
    %68 = vector.broadcast %cst_30 : f32 to vector<4x384xf32>
    %cst_31 = arith.constant 0.000000e+00 : f32
    %69 = vector.broadcast %cst_31 : f32 to vector<4x384xf32>
    %c4_32 = arith.constant 4 : index
    %c0_33 = arith.constant 0 : index
    %70 = vector.load %arg1[%c4_32, %c0_33] : memref<8x384xf32, #tpu.memory_space<vmem>>, vector<1x384xf32>
    %c4_34 = arith.constant 4 : index
    %c0_35 = arith.constant 0 : index
    %71 = vector.load %arg2[%c4_34, %c0_35] : memref<8x384xf32, #tpu.memory_space<vmem>>, vector<1x384xf32>
    %c0_36 = arith.constant 0 : index
    %c0_37 = arith.constant 0 : index
    %72 = vector.load %arg3[%c0_36, %c0_37] : memref<16x384xf32, #tpu.memory_space<vmem>>, vector<4x384xf32>
    %c0_38 = arith.constant 0 : index
    %c0_39 = arith.constant 0 : index
    %73 = vector.load %arg4[%c0_38, %c0_39] : memref<16x384xf32, #tpu.memory_space<vmem>>, vector<4x384xf32>
    %74 = vector.broadcast %70 : vector<1x384xf32> to vector<4x384xf32>
    %75 = arith.mulf %74, %72 : vector<4x384xf32>
    %76 = vector.broadcast %71 : vector<1x384xf32> to vector<4x384xf32>
    %77 = arith.mulf %76, %73 : vector<4x384xf32>
    %78 = arith.subf %75, %77 : vector<4x384xf32>
    %79 = arith.addf %68, %78 : vector<4x384xf32>
    %80 = vector.broadcast %70 : vector<1x384xf32> to vector<4x384xf32>
    %81 = arith.mulf %80, %73 : vector<4x384xf32>
    %82 = vector.broadcast %71 : vector<1x384xf32> to vector<4x384xf32>
    %83 = arith.mulf %82, %72 : vector<4x384xf32>
    %84 = arith.addf %81, %83 : vector<4x384xf32>
    %85 = arith.addf %69, %84 : vector<4x384xf32>
    %c5 = arith.constant 5 : index
    %c0_40 = arith.constant 0 : index
    %86 = vector.load %arg1[%c5, %c0_40] : memref<8x384xf32, #tpu.memory_space<vmem>>, vector<1x384xf32>
    %c5_41 = arith.constant 5 : index
    %c0_42 = arith.constant 0 : index
    %87 = vector.load %arg2[%c5_41, %c0_42] : memref<8x384xf32, #tpu.memory_space<vmem>>, vector<1x384xf32>
    %c4_43 = arith.constant 4 : index
    %c0_44 = arith.constant 0 : index
    %88 = vector.load %arg3[%c4_43, %c0_44] : memref<16x384xf32, #tpu.memory_space<vmem>>, vector<4x384xf32>
    %c4_45 = arith.constant 4 : index
    %c0_46 = arith.constant 0 : index
    %89 = vector.load %arg4[%c4_45, %c0_46] : memref<16x384xf32, #tpu.memory_space<vmem>>, vector<4x384xf32>
    %90 = vector.broadcast %86 : vector<1x384xf32> to vector<4x384xf32>
    %91 = arith.mulf %90, %88 : vector<4x384xf32>
    %92 = vector.broadcast %87 : vector<1x384xf32> to vector<4x384xf32>
    %93 = arith.mulf %92, %89 : vector<4x384xf32>
    %94 = arith.subf %91, %93 : vector<4x384xf32>
    %95 = arith.addf %79, %94 : vector<4x384xf32>
    %96 = vector.broadcast %86 : vector<1x384xf32> to vector<4x384xf32>
    %97 = arith.mulf %96, %89 : vector<4x384xf32>
    %98 = vector.broadcast %87 : vector<1x384xf32> to vector<4x384xf32>
    %99 = arith.mulf %98, %88 : vector<4x384xf32>
    %100 = arith.addf %97, %99 : vector<4x384xf32>
    %101 = arith.addf %85, %100 : vector<4x384xf32>
    %c6 = arith.constant 6 : index
    %c0_47 = arith.constant 0 : index
    %102 = vector.load %arg1[%c6, %c0_47] : memref<8x384xf32, #tpu.memory_space<vmem>>, vector<1x384xf32>
    %c6_48 = arith.constant 6 : index
    %c0_49 = arith.constant 0 : index
    %103 = vector.load %arg2[%c6_48, %c0_49] : memref<8x384xf32, #tpu.memory_space<vmem>>, vector<1x384xf32>
    %c8_50 = arith.constant 8 : index
    %c0_51 = arith.constant 0 : index
    %104 = vector.load %arg3[%c8_50, %c0_51] : memref<16x384xf32, #tpu.memory_space<vmem>>, vector<4x384xf32>
    %c8_52 = arith.constant 8 : index
    %c0_53 = arith.constant 0 : index
    %105 = vector.load %arg4[%c8_52, %c0_53] : memref<16x384xf32, #tpu.memory_space<vmem>>, vector<4x384xf32>
    %106 = vector.broadcast %102 : vector<1x384xf32> to vector<4x384xf32>
    %107 = arith.mulf %106, %104 : vector<4x384xf32>
    %108 = vector.broadcast %103 : vector<1x384xf32> to vector<4x384xf32>
    %109 = arith.mulf %108, %105 : vector<4x384xf32>
    %110 = arith.subf %107, %109 : vector<4x384xf32>
    %111 = arith.addf %95, %110 : vector<4x384xf32>
    %112 = vector.broadcast %102 : vector<1x384xf32> to vector<4x384xf32>
    %113 = arith.mulf %112, %105 : vector<4x384xf32>
    %114 = vector.broadcast %103 : vector<1x384xf32> to vector<4x384xf32>
    %115 = arith.mulf %114, %104 : vector<4x384xf32>
    %116 = arith.addf %113, %115 : vector<4x384xf32>
    %117 = arith.addf %101, %116 : vector<4x384xf32>
    %c7 = arith.constant 7 : index
    %c0_54 = arith.constant 0 : index
    %118 = vector.load %arg1[%c7, %c0_54] : memref<8x384xf32, #tpu.memory_space<vmem>>, vector<1x384xf32>
    %c7_55 = arith.constant 7 : index
    %c0_56 = arith.constant 0 : index
    %119 = vector.load %arg2[%c7_55, %c0_56] : memref<8x384xf32, #tpu.memory_space<vmem>>, vector<1x384xf32>
    %c12_57 = arith.constant 12 : index
    %c0_58 = arith.constant 0 : index
    %120 = vector.load %arg3[%c12_57, %c0_58] : memref<16x384xf32, #tpu.memory_space<vmem>>, vector<4x384xf32>
    %c12_59 = arith.constant 12 : index
    %c0_60 = arith.constant 0 : index
    %121 = vector.load %arg4[%c12_59, %c0_60] : memref<16x384xf32, #tpu.memory_space<vmem>>, vector<4x384xf32>
    %122 = vector.broadcast %118 : vector<1x384xf32> to vector<4x384xf32>
    %123 = arith.mulf %122, %120 : vector<4x384xf32>
    %124 = vector.broadcast %119 : vector<1x384xf32> to vector<4x384xf32>
    %125 = arith.mulf %124, %121 : vector<4x384xf32>
    %126 = arith.subf %123, %125 : vector<4x384xf32>
    %127 = arith.addf %111, %126 : vector<4x384xf32>
    %128 = vector.broadcast %118 : vector<1x384xf32> to vector<4x384xf32>
    %129 = arith.mulf %128, %121 : vector<4x384xf32>
    %130 = vector.broadcast %119 : vector<1x384xf32> to vector<4x384xf32>
    %131 = arith.mulf %130, %120 : vector<4x384xf32>
    %132 = arith.addf %129, %131 : vector<4x384xf32>
    %133 = arith.addf %117, %132 : vector<4x384xf32>
    %c4_61 = arith.constant 4 : index
    %c0_62 = arith.constant 0 : index
    %134 = vector.load %arg5[%c4_61, %c0_62] : memref<8x384xf32, #tpu.memory_space<vmem>>, vector<4x384xf32>
    tpu.vector_store %arg5[%c4_61, %c0_62], %127 {strides = array<i32>} : memref<8x384xf32, #tpu.memory_space<vmem>>, vector<4x384xf32>,
    %c4_63 = arith.constant 4 : index
    %c0_64 = arith.constant 0 : index
    %135 = vector.load %arg6[%c4_63, %c0_64] : memref<8x384xf32, #tpu.memory_space<vmem>>, vector<4x384xf32>
    tpu.vector_store %arg6[%c4_63, %c0_64], %133 {strides = array<i32>} : memref<8x384xf32, #tpu.memory_space<vmem>>, vector<4x384xf32>,
    return
  }
  func.func @transform_0(%arg0: i32) -> (i32, i32) {
    %c0_i32 = arith.constant 0 : i32
    %c0_i32_0 = arith.constant 0 : i32
    return %c0_i32, %arg0 : i32, i32
  }
  func.func @transform_1(%arg0: i32) -> (i32, i32) {
    %c0_i32 = arith.constant 0 : i32
    %c0_i32_0 = arith.constant 0 : i32
    return %c0_i32, %arg0 : i32, i32
  }
  func.func @transform_2(%arg0: i32) -> (i32, i32) {
    %c0_i32 = arith.constant 0 : i32
    %c0_i32_0 = arith.constant 0 : i32
    return %c0_i32, %arg0 : i32, i32
  }
  func.func @transform_3(%arg0: i32) -> (i32, i32) {
    %c0_i32 = arith.constant 0 : i32
    %c0_i32_0 = arith.constant 0 : i32
    return %c0_i32, %arg0 : i32, i32
  }
  func.func @transform_4(%arg0: i32) -> (i32, i32) {
    %c0_i32 = arith.constant 0 : i32
    %c0_i32_0 = arith.constant 0 : i32
    return %c0_i32, %arg0 : i32, i32
  }
  func.func @transform_5(%arg0: i32) -> (i32, i32) {
    %c0_i32 = arith.constant 0 : i32
    %c0_i32_0 = arith.constant 0 : i32
    return %c0_i32, %arg0 : i32, i32
  }
}

</mosaic_0001>

<bundles_post_ra>
// kernel: forward.1
= control target key start
LH: loop header
LB: loop body
LE: loop exit
PB: predicated region body
PF: predicated region fallthrough
CT: control target
= control target key end

     0   :  { %v28_v0 = vlaneseq  ;;  %s1418_s0 = inlined_call_operand.vmem [shape: f32[8,384], index: 0, kind: input, shape index: {}]   ;;  %s1419_s1 = inlined_call_operand.vmem [shape: f32[8,384], index: 1, kind: input, shape index: {}]   ;;  %s1420_s2 = inlined_call_operand.vmem [shape: f32[16,384], index: 2, kind: input, shape index: {}]   ;;  %s1421_s3 = inlined_call_operand.vmem [shape: f32[16,384], index: 3, kind: input, shape index: {}]   ;;  %s1422_s4 = inlined_call_operand.vmem [shape: f32[8,384], index: 4, kind: output, shape index: {0}]   ;;  %s1423_s5 = inlined_call_operand.vmem [shape: f32[8,384], index: 5, kind: output, shape index: {1}]  }
   0x1   :  { %v702_v1 = vld [vmem:[%s1418_s0] ss:$8 sm:$0x7]  ;;  %v724_v6 = vld [vmem:[%s1418_s0 + $0x1] ss:$8 sm:$0x7] }
   0x2   :  { %v707_v2 = vld [vmem:[%s1419_s1] ss:$8 sm:$0x7]  ;;  %v709_v3 = vshrl.u32 %v28_v0, 7  ;;  %v737_v9 = vld [vmem:[%s1420_s2] sm:$0xf0] }
   0x3   :  { %v714_v4 = vld [vmem:[%s1420_s2] sm:$0xf]  ;;  %v742_v10 = vld [vmem:[%s1421_s3] sm:$0xf0]  ;;  %v774_v18 = vld [vmem:[%s1420_s2 + $0x18] sm:$0xf] }
   0x4   :  { %v719_v5 = vld [vmem:[%s1421_s3] sm:$0xf]  ;;  %v732_v8 = vsub.s32 0, %v709_v3  ;;  %v745_v11 = vsub.s32 1, %v709_v3  ;;  %v779_v19 = vld [vmem:[%s1421_s3 + $0x18] sm:$0xf] }
   0x5   :  { %v729_v7 = vld [vmem:[%s1419_s1 + $0x1] ss:$8 sm:$0x7]  ;;  %v750_v12 = vld [vmem:[%s1418_s0 + $0x2] ss:$8 sm:$0x7] }
   0x6   :  { %1433 = vst [vmem:[#allocation2_spill] sm:$0xff] %v732_v8  ;;  %1434 = vst [vmem:[#allocation3_spill] sm:$0xff] %v745_v11  ;;  %v755_v13 = vld [vmem:[%s1419_s1 + $0x2] ss:$8 sm:$0x7]  ;;  %v31_v14 = vrot.slane %v702_v1, %v732_v8  ;;  %v761_v15 = vrot.slane %v707_v2, %v732_v8  ;;  %v765_v16 = vrot.slane %v724_v6, %v732_v8 }
   0x7   :  { %v769_v17 = vrot.slane %v729_v7, %v732_v8  ;;  %v784_v20 = vld [vmem:[%s1420_s2 + $0x18] sm:$0xf0]  ;;  %v788_v21 = vrot.slane %v750_v12, %v732_v8  ;;  %v792_v22 = vrot.slane %v755_v13, %v732_v8  ;;  %v797_v23 = vld [vmem:[%s1418_s0 + $0x3] ss:$8 sm:$0x7]  ;;  %v806_v25 = vrot.slane %v702_v1, %v745_v11 }
   0x8   :  { %v802_v24 = vld [vmem:[%s1419_s1 + $0x3] ss:$8 sm:$0x7]  ;;  %v810_v26 = vrot.slane %v707_v2, %v745_v11  ;;  %v43_v27 = vmul.f32 %v31_v14, %v714_v4  ;;  %v62_v28 = vmul.f32 %v761_v15, %v719_v5  ;;  %v109_v29 = vmul.f32 %v765_v16, %v737_v9  ;;  %v822_v31 = vld [vmem:[%s1421_s3 + $0x18] sm:$0xf0] }
   0x9   :  { %v128_v30 = vmul.f32 %v769_v17, %v742_v10  ;;  %v827_v32 = vld [vmem:[%s1420_s2 + $0x8] sm:$0xf]  ;;  %v193_v34 = vmul.f32 %v788_v21, %v774_v18  ;;  %v212_v35 = vmul.f32 %v792_v22, %v779_v19  ;;  %v840_v36 = vrot.slane %v797_v23, %v732_v8  ;;  %v853_v42 = vld [vmem:[%s1420_s2 + $0x8] sm:$0xf0]  ;;  %v871_v48 = vld [vmem:[%s1420_s2 + $0x20] sm:$0xf] }
   0xa   :  { %v832_v33 = vld [vmem:[%s1421_s3 + $0x8] sm:$0xf]  ;;  %v844_v37 = vrot.slane %v802_v24, %v732_v8  ;;  %v65_v38 = vsub.f32 %v43_v27, %v62_v28  ;;  %v44_v40 = vmul.f32 %v806_v25, %v827_v32  ;;  %v862_v46 = vld [vmem:[%s1421_s3 + $0x8] sm:$0xf0]  ;;  %v866_v47 = vrot.slane %v724_v6, %v745_v11  ;;  %v880_v52 = vld [vmem:[%s1421_s3 + $0x20] sm:$0xf] }
   0xb   :  { %v131_v39 = vsub.f32 %v109_v29, %v128_v30  ;;  %v63_v41 = vmul.f32 %v810_v26, %v832_v33  ;;  %v215_v43 = vsub.f32 %v193_v34, %v212_v35  ;;  %v259_v44 = vmul.f32 %v840_v36, %v784_v20  ;;  %v889_v54 = vld [vmem:[%s1420_s2 + $0x20] sm:$0xf0] }
   0xc   :  { %v278_v45 = vmul.f32 %v844_v37, %v822_v31  ;;  %v875_v51 = vrot.slane %v729_v7, %v745_v11  ;;  %v884_v53 = vrot.slane %v750_v12, %v745_v11  ;;  %v110_v56 = vmul.f32 %v866_v47, %v853_v42  ;;  %v900_v58 = vld [vmem:[%s1421_s3 + $0x20] sm:$0xf0] }
   0xd   :  { %v137_v49 = vrot.slane %v131_v39, 4  ;;  %v66_v50 = vsub.f32 %v44_v40, %v63_v41  ;;  %v895_v57 = vrot.slane %v755_v13, %v745_v11  ;;  %v904_v59 = vrot.slane %v797_v23, %v745_v11  ;;  %v931_v39 = vld [vmem:[%s1421_s3 + $0x10] sm:$0xf] }
   0xe   :  { %v281_v55 = vsub.f32 %v259_v44, %v278_v45  ;;  %v129_v61 = vmul.f32 %v875_v51, %v862_v46  ;;  %v194_v62 = vmul.f32 %v884_v53, %v871_v48  ;;  %v912_v63 = vrot.slane %v802_v24, %v745_v11  ;;  %v950_v45 = vld [vmem:[%s1421_s3 + $0x10] sm:$0xf0] }
   0xf   :  { %v143_v60 = vadd.f32 %v137_v49, %v65_v38  ;;  %v213_v27 = vmul.f32 %v895_v57, %v880_v52  ;;  %v260_v28 = vmul.f32 %v904_v59, %v889_v54  ;;  %v919_v29 = vsub.s32 2, %v709_v3  ;;  %v926_v38 = vld [vmem:[%s1420_s2 + $0x10] sm:$0xf]  ;;  %v936_v3 = vld [vmem:[%s1420_s2 + $0x10] sm:$0xf0] }
  0x10   :  { %v287_v0 = vrot.slane %v281_v55, 4  ;;  %v132_v34 = vsub.f32 %v110_v56, %v129_v61  ;;  %v279_v35 = vmul.f32 %v912_v63, %v900_v58  ;;  %v71_v40 = vmul.f32 %v31_v14, %v719_v5  ;;  %v974_v61 = vld [vmem:[%s1421_s3 + $0x28] sm:$0xf] }
  0x11   :  { %1435 = vst [vmem:[#allocation4_spill] sm:$0xff] %v919_v29  ;;  %v218_v30 = vadd.f32 %v215_v43, %v143_v60  ;;  %v216_v41 = vsub.f32 %v194_v62, %v213_v27  ;;  %v941_v43 = vrot.slane %v702_v1, %v919_v29  ;;  %v945_v44 = vrot.slane %v707_v2, %v919_v29  ;;  %v963_v2 = vld [vmem:[%s1420_s2 + $0x28] sm:$0xf] }
  0x12   :  { %v954_v49 = vrot.slane %v724_v6, %v919_v29  ;;  %v138_v5 = vrot.slane %v132_v34, 4  ;;  %v282_v14 = vsub.f32 %v260_v28, %v279_v35  ;;  %v958_v1 = vrot.slane %v729_v7, %v919_v29 }
  0x13   :  { %v293_v55 = vadd.f32 %v287_v0, %v218_v30  ;;  %v45_v56 = vmul.f32 %v941_v43, %v926_v38  ;;  %v64_v60 = vmul.f32 %v945_v44, %v931_v39  ;;  %v978_v7 = vrot.slane %v750_v12, %v919_v29  ;;  %v990_v30 = vld [vmem:[%s1420_s2 + $0x28] sm:$0xf0] }
  0x14   :  { %v111_v6 = vmul.f32 %v954_v49, %v936_v3  ;;  %v144_v62 = vadd.f32 %v138_v5, %v66_v50  ;;  %v288_v0 = vrot.slane %v282_v14, 4  ;;  %v130_v27 = vmul.f32 %v958_v1, %v950_v45  ;;  %v995_v12 = vld [vmem:[%s1421_s3 + $0x28] sm:$0xf0] }
  0x15   :  { %317 = vst [vmem:[%s1422_s4] sm:$0xf] %v293_v55  ;;  %v208_v28 = vrot.slane %v755_v13, %v919_v29  ;;  %v67_v34 = vsub.f32 %v45_v56, %v64_v60  ;;  %v195_v50 = vmul.f32 %v978_v7, %v963_v2  ;;  %v255_v35 = vrot.slane %v797_v23, %v919_v29 }
  0x16   :  { %v1003_v13 = vrot.slane %v802_v24, %v919_v29  ;;  %v219_v55 = vadd.f32 %v216_v41, %v144_v62  ;;  %v133_v5 = vsub.f32 %v111_v6, %v130_v27  ;;  %v74_v11 = vmul.f32 %v761_v15, %v714_v4 }
  0x17   :  { %v214_v14 = vmul.f32 %v208_v28, %v974_v61  ;;  %v261_v8 = vmul.f32 %v255_v35, %v990_v30  ;;  %v146_v60 = vmul.f32 %v765_v16, %v742_v10  ;;  %v149_v23 = vmul.f32 %v769_v17, %v737_v9 }
  0x18   :  { %v280_v56 = vmul.f32 %v1003_v13, %v995_v12  ;;  %v294_v24 = vadd.f32 %v288_v0, %v219_v55  ;;  %v139_v29 = vrot.slane %v133_v5, 4  ;;  %v77_v6 = vadd.f32 %v74_v11, %v71_v40  ;;  %v1109_v55 = vld [vmem:[%s1421_s3] sm:$0xf0] }
  0x19   :  { %v217_v41 = vsub.f32 %v195_v50, %v214_v14  ;;  %v152_v27 = vadd.f32 %v149_v23, %v146_v60  ;;  %v221_v4 = vmul.f32 %v788_v21, %v779_v19  ;;  %v224_v15 = vmul.f32 %v792_v22, %v774_v18  ;;  %v1127_v60 = vld [vmem:[%s1420_s2 + $0x18] sm:$0xf] }
  0x1a   :  { %v283_v62 = vsub.f32 %v261_v8, %v280_v56  ;;  %318 = vst [vmem:[%s1422_s4 + $0x8] sm:$0xf] %v294_v24  ;;  %v145_v10 = vadd.f32 %v139_v29, %v67_v34  ;;  %v296_v9 = vmul.f32 %v840_v36, %v822_v31  ;;  %v299_v16 = vmul.f32 %v844_v37, %v784_v20 }
  0x1b   :  { %v72_v8 = vmul.f32 %v806_v25, %v832_v33  ;;  %v158_v17 = vrot.slane %v152_v27, 4  ;;  %v227_v19 = vadd.f32 %v224_v15, %v221_v4  ;;  %v75_v18 = vmul.f32 %v810_v26, %v827_v32  ;;  %v1147_v27 = vld [vmem:[%s1419_s1 + $0x7] ss:$8 sm:$0x7] }
  0x1c   :  { %v289_v11 = vrot.slane %v283_v62, 4  ;;  %v220_v21 = vadd.f32 %v217_v41, %v145_v10  ;;  %v302_v22 = vadd.f32 %v299_v16, %v296_v9  ;;  %v147_v29 = vmul.f32 %v866_v47, %v862_v46  ;;  %v1047_v47 = vld [vmem:[%s1418_s0 + $0x4] ss:$8 sm:$0x7]  ;;  %v1156_v16 = vld [vmem:[%s1421_s3 + $0x18] sm:$0xf] }
  0x1d   :  { %v150_v31 = vmul.f32 %v875_v51, %v853_v42  ;;  %v164_v36 = vadd.f32 %v158_v17, %v77_v6  ;;  %v78_v40 = vadd.f32 %v75_v18, %v72_v8  ;;  %v222_v20 = vmul.f32 %v884_v53, %v880_v52  ;;  %v1142_v62 = vld [vmem:[%s1418_s0 + $0x7] ss:$8 sm:$0x7]  ;;  %v1169_v18 = vld [vmem:[%s1420_s2 + $0x18] sm:$0xf0] }
  0x1e   :  { %v225_v25 = vmul.f32 %v895_v57, %v871_v48  ;;  %v295_v33 = vadd.f32 %v289_v11, %v220_v21  ;;  %v308_v37 = vrot.slane %v302_v22, 4  ;;  %v297_v26 = vmul.f32 %v904_v59, %v900_v58  ;;  %v1066_v57 = vld [vmem:[%s1420_s2] sm:$0xf]  ;;  %v1174_v21 = vld [vmem:[%s1421_s3 + $0x18] sm:$0xf0] }
  0x1f   :  { %v153_v0 = vadd.f32 %v150_v31, %v147_v29  ;;  %v230_v32 = vadd.f32 %v227_v19, %v164_v36  ;;  %v300_v46 = vmul.f32 %v912_v63, %v889_v54  ;;  %v73_v42 = vmul.f32 %v941_v43, %v931_v39  ;;  %v1061_v54 = vld [vmem:[%s1419_s1 + $0x4] ss:$8 sm:$0x7]  ;;  %v1074_v39 = vld [vmem:[%s1421_s3] sm:$0xf] }
  0x20   :  { %v228_v34 = vadd.f32 %v225_v25, %v222_v20  ;;  %319 = vst [vmem:[%s1422_s4 + $0x10] sm:$0xf] %v295_v33  ;;  %v76_v51 = vmul.f32 %v945_v44, %v926_v38  ;;  %v148_v52 = vmul.f32 %v954_v49, %v950_v45  ;;  %v151_v53 = vmul.f32 %v958_v1, %v936_v3  ;;  %v1079_v3 = vld [vmem:[%s1418_s0 + $0x5] ss:$8 sm:$0x7] }
  0x21   :  { %v159_v48 = vrot.slane %v153_v0, 4  ;;  %v314_v58 = vadd.f32 %v308_v37, %v230_v32  ;;  %v303_v59 = vadd.f32 %v300_v46, %v297_v26  ;;  %v223_v63 = vmul.f32 %v978_v7, %v974_v61  ;;  %v1085_v1 = vld [vmem:[%s1419_s1 + $0x5] ss:$8 sm:$0x7]  ;;  %v1195_v20 = vld [vmem:[%s1421_s3 + $0x8] sm:$0xf] }
  0x22   :  { %v226_v38 = vmul.f32 %v208_v28, %v963_v2  ;;  %v79_v44 = vadd.f32 %v76_v51, %v73_v42  ;;  %v154_v45 = vadd.f32 %v151_v53, %v148_v52  ;;  %v298_v49 = vmul.f32 %v255_v35, %v995_v12  ;;  %v1090_v2 = vld [vmem:[%s1418_s0 + $0x6] ss:$8 sm:$0x7] }
  0x23   :  { %v165_v43 = vadd.f32 %v159_v48, %v78_v40  ;;  %320 = vst [vmem:[%s1423_s5] sm:$0xf] %v314_v58  ;;  %v309_v61 = vrot.slane %v303_v59, 4  ;;  %v301_v28 = vmul.f32 %v1003_v13, %v990_v30  ;;  %v1436_v12 = vld [vmem:[#allocation2_spill] sm:$0xff]  ;;  %v1190_v40 = vld [vmem:[%s1420_s2 + $0x8] sm:$0xf] }
  0x24   :  { %v229_v7 = vadd.f32 %v226_v38, %v223_v63  ;;  %v1099_v50 = vrot.slane %v1047_v47, %v1436_v12  ;;  %v1104_v35 = vld [vmem:[%s1420_s2] sm:$0xf0]  ;;  %v160_v14 = vrot.slane %v154_v45, 4  ;;  %v1113_v56 = vrot.slane %v1061_v54, %v1436_v12  ;;  %v1437_v37 = vld [vmem:[#allocation3_spill] sm:$0xff]  ;;  %v1232_v63 = vld [vmem:[%s1420_s2 + $0x20] sm:$0xf] }
  0x25   :  { %v231_v5 = vadd.f32 %v228_v34, %v165_v43  ;;  %v1117_v30 = vrot.slane %v1079_v3, %v1436_v12  ;;  %v1122_v13 = vld [vmem:[%s1419_s1 + $0x6] ss:$8 sm:$0x7]  ;;  %v304_v23 = vadd.f32 %v301_v28, %v298_v49  ;;  %v1133_v41 = vrot.slane %v1085_v1, %v1436_v12  ;;  %v1246_v45 = vld [vmem:[%s1421_s3 + $0x20] sm:$0xf] }
  0x26   :  { %v349_v24 = vmul.f32 %v1099_v50, %v1066_v57  ;;  %v1137_v6 = vrot.slane %v1090_v2, %v1436_v12  ;;  %v166_v15 = vadd.f32 %v160_v14, %v79_v44  ;;  %v368_v10 = vmul.f32 %v1113_v56, %v1074_v39  ;;  %v1210_v32 = vld [vmem:[%s1420_s2 + $0x8] sm:$0xf0] }
  0x27   :  { %v315_v4 = vadd.f32 %v309_v61, %v231_v5  ;;  %v415_v9 = vmul.f32 %v1117_v30, %v1104_v35  ;;  %v310_v8 = vrot.slane %v304_v23, 4  ;;  %v434_v11 = vmul.f32 %v1133_v41, %v1109_v55  ;;  %v1227_v59 = vld [vmem:[%s1421_s3 + $0x8] sm:$0xf0]  ;;  %v1255_v61 = vld [vmem:[%s1420_s2 + $0x20] sm:$0xf0] }
  0x28   :  { %v499_v17 = vmul.f32 %v1137_v6, %v1127_v60  ;;  %v1164_v19 = vrot.slane %v1122_v13, %v1436_v12  ;;  %v232_v22 = vadd.f32 %v229_v7, %v166_v15  ;;  %v371_v29 = vsub.f32 %v349_v24, %v368_v10  ;;  %v1264_v5 = vld [vmem:[%s1421_s3 + $0x20] sm:$0xf0]  ;;  %v1281_v10 = vld [vmem:[%s1420_s2 + $0x10] sm:$0xf] }
  0x29   :  { %321 = vst [vmem:[%s1423_s5 + $0x8] sm:$0xf] %v315_v4  ;;  %v1181_v31 = vrot.slane %v1142_v62, %v1436_v12  ;;  %v1185_v36 = vrot.slane %v1147_v27, %v1436_v12  ;;  %v437_v25 = vsub.f32 %v415_v9, %v434_v11  ;;  %v1201_v0 = vrot.slane %v1047_v47, %v1437_v37 }
  0x2a   :  { %v518_v33 = vmul.f32 %v1164_v19, %v1156_v16  ;;  %v1205_v26 = vrot.slane %v1061_v54, %v1437_v37  ;;  %v316_v34 = vadd.f32 %v310_v8, %v232_v22  ;;  %v1218_v48 = vrot.slane %v1079_v3, %v1437_v37  ;;  %v1438_v22 = vld [vmem:[#allocation4_spill] sm:$0xff] }
  0x2b   :  { %v565_v46 = vmul.f32 %v1181_v31, %v1169_v18  ;;  %v584_v42 = vmul.f32 %v1185_v36, %v1174_v21  ;;  %v443_v51 = vrot.slane %v437_v25, 4  ;;  %v350_v53 = vmul.f32 %v1201_v0, %v1190_v40  ;;  %v1299_v25 = vld [vmem:[%s1420_s2 + $0x10] sm:$0xf0] }
  0x2c   :  { %v521_v52 = vsub.f32 %v499_v17, %v518_v33  ;;  %v369_v58 = vmul.f32 %v1205_v26, %v1195_v20  ;;  %322 = vst [vmem:[%s1423_s5 + $0x10] sm:$0xf] %v316_v34  ;;  %v416_v43 = vmul.f32 %v1218_v48, %v1210_v32  ;;  %v1241_v44 = vrot.slane %v1085_v1, %v1437_v37  ;;  %v1290_v17 = vld [vmem:[%s1421_s3 + $0x10] sm:$0xf] }
  0x2d   :  { %v587_v38 = vsub.f32 %v565_v46, %v584_v42  ;;  %v1250_v49 = vrot.slane %v1090_v2, %v1437_v37  ;;  %v449_v7 = vadd.f32 %v443_v51, %v371_v29  ;;  %v1259_v12 = vrot.slane %v1122_v13, %v1437_v37  ;;  %1439 = vst [vmem:[#allocation2_spill] sm:$0xff] %v1299_v25  ;;  %v1310_v46 = vld [vmem:[%s1421_s3 + $0x10] sm:$0xf0] }
  0x2e   :  { %v372_v28 = vsub.f32 %v350_v53, %v369_v58  ;;  %v1268_v14 = vrot.slane %v1142_v62, %v1437_v37  ;;  %v435_v24 = vmul.f32 %v1241_v44, %v1227_v59  ;;  %v1276_v15 = vrot.slane %v1147_v27, %v1437_v37 }
  0x2f   :  { %v593_v23 = vrot.slane %v587_v38, 4  ;;  %v500_v4 = vmul.f32 %v1250_v49, %v1232_v63  ;;  %v524_v9 = vadd.f32 %v521_v52, %v449_v7  ;;  %v519_v8 = vmul.f32 %v1259_v12, %v1246_v45  ;;  %v1334_v7 = vld [vmem:[%s1421_s3 + $0x28] sm:$0xf] }
  0x30   :  { %v566_v11 = vmul.f32 %v1268_v14, %v1255_v61  ;;  %v1294_v29 = vrot.slane %v1047_v47, %v1438_v22  ;;  %v438_v33 = vsub.f32 %v416_v43, %v435_v24  ;;  %v585_v37 = vmul.f32 %v1276_v15, %v1264_v5 }
  0x31   :  { %v1305_v34 = vrot.slane %v1061_v54, %v1438_v22  ;;  %v1314_v47 = vrot.slane %v1079_v3, %v1438_v22  ;;  %v599_v42 = vadd.f32 %v593_v23, %v524_v9  ;;  %v522_v51 = vsub.f32 %v500_v4, %v519_v8  ;;  %v1329_v3 = vld [vmem:[%s1420_s2 + $0x28] sm:$0xf]  ;;  %v1345_v9 = vld [vmem:[%s1420_s2 + $0x28] sm:$0xf0] }
  0x32   :  { %v351_v52 = vmul.f32 %v1294_v29, %v1281_v10  ;;  %v1320_v53 = vrot.slane %v1085_v1, %v1438_v22  ;;  %v444_v54 = vrot.slane %v438_v33, 4  ;;  %v588_v58 = vsub.f32 %v566_v11, %v585_v37  ;;  %1441 = vst [vmem:[#allocation4_spill] sm:$0xff] %v1329_v3  ;;  %v548_v37 = vld [vmem:[%s1421_s3 + $0x28] sm:$0xf0] }
  0x33   :  { %v370_v38 = vmul.f32 %v1305_v34, %v1290_v17  ;;  %v417_v43 = vmul.f32 %v1314_v47, %v1299_v25  ;;  %v626_v1 = vrot.slane %v599_v42, 4  ;;  %v495_v24 = vrot.slane %v1090_v2, %v1438_v22 }
  0x34   :  { %1440 = vst [vmem:[#allocation3_spill] sm:$0xff] %v1320_v53  ;;  %v436_v23 = vmul.f32 %v1320_v53, %v1310_v46  ;;  %v514_v4 = vrot.slane %v1122_v13, %v1438_v22  ;;  %v450_v8 = vadd.f32 %v444_v54, %v372_v28  ;;  %v594_v11 = vrot.slane %v588_v58, 4 }
  0x35   :  { %v373_v33 = vsub.f32 %v351_v52, %v370_v38  ;;  %v561_v42 = vrot.slane %v1142_v62, %v1438_v22  ;;  %632 = vst [vmem:[%s1422_s4] sm:$0xf0] %v626_v1  ;;  %v501_v13 = vmul.f32 %v495_v24, %v1329_v3  ;;  %v580_v28 = vrot.slane %v1147_v27, %v1438_v22 }
  0x36   :  { %v439_v2 = vsub.f32 %v417_v43, %v436_v23  ;;  %v520_v53 = vmul.f32 %v514_v4, %v1334_v7  ;;  %v525_v52 = vadd.f32 %v522_v51, %v450_v8  ;;  %v377_v58 = vmul.f32 %v1099_v50, %v1074_v39 }
  0x37   :  { %v567_v54 = vmul.f32 %v561_v42, %v1345_v9  ;;  %v380_v62 = vmul.f32 %v1113_v56, %v1066_v57  ;;  %v586_v1 = vmul.f32 %v580_v28, %v548_v37  ;;  %v452_v43 = vmul.f32 %v1117_v30, %v1109_v55 }
  0x38   :  { %v445_v38 = vrot.slane %v439_v2, 4  ;;  %v523_v25 = vsub.f32 %v501_v13, %v520_v53  ;;  %v600_v23 = vadd.f32 %v594_v11, %v525_v52  ;;  %v455_v27 = vmul.f32 %v1133_v41, %v1104_v35 }
  0x39   :  { %v383_v3 = vadd.f32 %v380_v62, %v377_v58  ;;  %v527_v22 = vmul.f32 %v1137_v6, %v1156_v16  ;;  %v589_v8 = vsub.f32 %v567_v54, %v586_v1  ;;  %v530_v39 = vmul.f32 %v1164_v19, %v1127_v60 }
  0x3a   :  { %v451_v51 = vadd.f32 %v445_v38, %v373_v33  ;;  %v602_v57 = vmul.f32 %v1181_v31, %v1174_v21  ;;  %v627_v50 = vrot.slane %v600_v23, 4  ;;  %v458_v56 = vadd.f32 %v455_v27, %v452_v43 }
  0x3b   :  { %v605_v55 = vmul.f32 %v1185_v36, %v1169_v18  ;;  %v378_v30 = vmul.f32 %v1201_v0, %v1195_v20  ;;  %v595_v41 = vrot.slane %v589_v8, 4  ;;  %v533_v53 = vadd.f32 %v530_v39, %v527_v22 }
  0x3c   :  { %v526_v35 = vadd.f32 %v523_v25, %v451_v51  ;;  %v381_v6 = vmul.f32 %v1205_v26, %v1190_v40  ;;  %633 = vst [vmem:[%s1422_s4 + $0x8] sm:$0xf0] %v627_v50  ;;  %v464_v60 = vrot.slane %v458_v56, 4  ;;  %v453_v19 = vmul.f32 %v1218_v48, %v1227_v59 }
  0x3d   :  { %v608_v16 = vadd.f32 %v605_v55, %v602_v57  ;;  %v456_v18 = vmul.f32 %v1241_v44, %v1210_v32  ;;  %v528_v36 = vmul.f32 %v1250_v49, %v1246_v45  ;;  %v531_v40 = vmul.f32 %v1259_v12, %v1232_v63  ;;  %v1442_v12 = vld [vmem:[#allocation2_spill] sm:$0xff] }
  0x3e   :  { %v601_v21 = vadd.f32 %v595_v41, %v526_v35  ;;  %v384_v31 = vadd.f32 %v381_v6, %v378_v30  ;;  %v470_v20 = vadd.f32 %v464_v60, %v383_v3  ;;  %v603_v25 = vmul.f32 %v1268_v14, %v1264_v5  ;;  %v1443_v5 = vld [vmem:[#allocation3_spill] sm:$0xff] }
  0x3f   :  { %v614_v0 = vrot.slane %v608_v16, 4  ;;  %v459_v26 = vadd.f32 %v456_v18, %v453_v19  ;;  %v534_v33 = vadd.f32 %v531_v40, %v528_v36  ;;  %v606_v48 = vmul.f32 %v1276_v15, %v1255_v61  ;;  %v1444_v15 = vld [vmem:[#allocation4_spill] sm:$0xff] }
  0x40   :  { %v628_v11 = vrot.slane %v601_v21, 4  ;;  %v379_v32 = vmul.f32 %v1294_v29, %v1290_v17  ;;  %v536_v59 = vadd.f32 %v533_v53, %v470_v20  ;;  %v382_v45 = vmul.f32 %v1305_v34, %v1281_v10 }
  0x41   :  { %v465_v44 = vrot.slane %v459_v26, 4  ;;  %v454_v63 = vmul.f32 %v1314_v47, %v1310_v46  ;;  %v609_v49 = vadd.f32 %v606_v48, %v603_v25  ;;  %v457_v14 = vmul.f32 %v1443_v5, %v1442_v12 }
  0x42   :  { %634 = vst [vmem:[%s1422_s4 + $0x10] sm:$0xf0] %v628_v11  ;;  %v529_v61 = vmul.f32 %v495_v24, %v1334_v7  ;;  %v532_v17 = vmul.f32 %v514_v4, %v1444_v15  ;;  %v620_v29 = vadd.f32 %v614_v0, %v536_v59  ;;  %v604_v2 = vmul.f32 %v561_v42, %v548_v37 }
  0x43   :  { %v471_v3 = vadd.f32 %v465_v44, %v384_v31  ;;  %v615_v13 = vrot.slane %v609_v49, 4  ;;  %v385_v10 = vadd.f32 %v382_v45, %v379_v32  ;;  %v460_v34 = vadd.f32 %v457_v14, %v454_v63 }
  0x44   :  { %v607_v46 = vmul.f32 %v580_v28, %v1345_v9  ;;  %v638_v47 = vrot.slane %v620_v29, 4  ;;  %v535_v58 = vadd.f32 %v532_v17, %v529_v61 }
  0x45   :  { %v537_v52 = vadd.f32 %v534_v33, %v471_v3  ;;  %v466_v54 = vrot.slane %v460_v34, 4 }
  0x46   :  { %v610_v62 = vadd.f32 %v607_v46, %v604_v2  ;;  %644 = vst [vmem:[%s1423_s5] sm:$0xf0] %v638_v47 }
  0x47   :  { %v621_v7 = vadd.f32 %v615_v13, %v537_v52  ;;  %v472_v24 = vadd.f32 %v466_v54, %v385_v10 }
  0x48   :  { %v616_v4 = vrot.slane %v610_v62, 4 }
  0x49   :  { %v639_v38 = vrot.slane %v621_v7, 4  ;;  %v538_v1 = vadd.f32 %v535_v58, %v472_v24 }
  0x4b   :  { %645 = vst [vmem:[%s1423_s5 + $0x8] sm:$0xf0] %v639_v38  ;;  %v622_v37 = vadd.f32 %v616_v4, %v538_v1 }
  0x4d   :  { %v640_v9 = vrot.slane %v622_v37, 4 }
  0x4f   :  { %646 = vst [vmem:[%s1423_s5 + $0x10] sm:$0xf0] %v640_v9 }

// kernel: reverse.0
= control target key start
LH: loop header
LB: loop body
LE: loop exit
PB: predicated region body
PF: predicated region fallthrough
CT: control target
= control target key end

     0   :  { %v104_v3 = vlaneseq  ;;  %v110_v18 = vld [vmem:[#allocation0 + $0x7] ss:$-1 sm:$0xff]  ;;  %v138_v19 = vld [vmem:[#allocation0 + $0x1f] ss:$-1 sm:$0xff]  ;;  %v166_v22 = vld [vmem:[#allocation0 + $0x37] ss:$-1 sm:$0xff]  ;;  %s617_s0 = inlined_call_operand.vmem [shape: f32[2,4,32,15], index: 0, kind: input, shape index: {}]   ;;  %s618_s1 = inlined_call_operand.vmem [shape: f32[2,4,32,15], index: 1, kind: output, shape index: {}]  }
   0x1   :  { %v60_v0 = vld [vmem:[%s617_s0] sm:$0xff]  ;;  %v62_v1 = vld [vmem:[%s617_s0 + $0x8] sm:$0xff]  ;;  %v64_v2 = vld [vmem:[%s617_s0 + $0x10] sm:$0xff]  ;;  %v111_v20 = vrot.slane %v110_v18, 1  ;;  %v139_v21 = vrot.slane %v138_v19, 1  ;;  %v167_v24 = vrot.slane %v166_v22, 1 }
   0x2   :  { %61 = vst [vmem:[#allocation0 + $0x8] sm:$0xff] %v60_v0  ;;  %63 = vst [vmem:[#allocation0 + $0x10] sm:$0xff] %v62_v1  ;;  %v66_v4 = vld [vmem:[%s617_s0 + $0x18] sm:$0xff]  ;;  %v68_v5 = vld [vmem:[%s617_s0 + $0x20] sm:$0xff]  ;;  %v513_v10 = vshrl.u32 %v104_v3, 7 }
   0x3   :  { %65 = vst [vmem:[#allocation0 + $0x20] sm:$0xff] %v64_v2  ;;  %v70_v6 = vld [vmem:[%s617_s0 + $0x28] sm:$0xff]  ;;  %67 = vst [vmem:[#allocation0 + $0x28] sm:$0xff] %v66_v4  ;;  %v72_v7 = vld [vmem:[%s617_s0 + $0x30] sm:$0xff] }
   0x4   :  { %69 = vst [vmem:[#allocation0 + $0x38] sm:$0xff] %v68_v5  ;;  %71 = vst [vmem:[#allocation0 + $0x40] sm:$0xff] %v70_v6  ;;  %v74_v8 = vld [vmem:[%s617_s0 + $0x38] sm:$0xff]  ;;  %v76_v9 = vld [vmem:[%s617_s0 + $0x40] sm:$0xff]  ;;  %vm106_vm0 = vcmp.lt.s32.totalorder %v513_v10, 7 }
   0x5   :  { %73 = vst [vmem:[#allocation0 + $0x50] sm:$0xff] %v72_v7  ;;  %75 = vst [vmem:[#allocation0 + $0x58] sm:$0xff] %v74_v8  ;;  %v78_v11 = vld [vmem:[%s617_s0 + $0x48] sm:$0xff]  ;;  %v80_v12 = vld [vmem:[%s617_s0 + $0x50] sm:$0xff] }
   0x6   :  { %77 = vst [vmem:[#allocation0 + $0x68] sm:$0xff] %v76_v9  ;;  %v82_v13 = vld [vmem:[%s617_s0 + $0x58] sm:$0xff]  ;;  %79 = vst [vmem:[#allocation0 + $0x70] sm:$0xff] %v78_v11  ;;  %v84_v14 = vld [vmem:[%s617_s0 + $0x60] sm:$0xff] }
   0x7   :  { %81 = vst [vmem:[#allocation0 + $0x80] sm:$0xff] %v80_v12  ;;  %83 = vst [vmem:[#allocation0 + $0x88] sm:$0xff] %v82_v13  ;;  %v86_v15 = vld [vmem:[%s617_s0 + $0x68] sm:$0xff]  ;;  %v88_v16 = vld [vmem:[%s617_s0 + $0x70] sm:$0xff] }
   0x8   :  { %85 = vst [vmem:[#allocation0 + $0x98] sm:$0xff] %v84_v14  ;;  %87 = vst [vmem:[#allocation0 + $0xa0] sm:$0xff] %v86_v15  ;;  %v90_v17 = vld [vmem:[%s617_s0 + $0x78] sm:$0xff]  ;;  %v194_v23 = vld [vmem:[#allocation0 + $0x4f] ss:$-1 sm:$0xff] }
   0x9   :  { %89 = vst [vmem:[#allocation0 + $0xb0] sm:$0xff] %v88_v16  ;;  %91 = vst [vmem:[#allocation0 + $0xb8] sm:$0xff] %v90_v17  ;;  %v195_v25 = vrot.slane %v194_v23, 1  ;;  %v222_v26 = vld [vmem:[#allocation0 + $0x67] ss:$-1 sm:$0xff] }
   0xa   :  { %v250_v27 = vld [vmem:[#allocation0 + $0x7f] ss:$-1 sm:$0xff]  ;;  %v97_v28 = vld [vmem:[#allocation0 + $0xf] ss:$-1 sm:$0xff]  ;;  %v102_v29 = vld [vmem:[#allocation0 + $0x17] ss:$-1 sm:$0xff] }
   0xb   :  { %112 = vst [vmem:[#allocation1 + $0x8] sm:$0xff] %v111_v20  ;;  %v115_v30 = vld [vmem:[#allocation0 + $0xf] ss:$-1 sm:$0xff]  ;;  %140 = vst [vmem:[#allocation1 + $0x18] sm:$0xff] %v139_v21  ;;  %v98_v31 = vrot.slane %v97_v28, 1  ;;  %v103_v32 = vrot.slane %v102_v29, 1 }
   0xc   :  { %v116_v33 = vrot.slane %v115_v30, 1  ;;  %v125_v34 = vld [vmem:[#allocation0 + $0x27] ss:$-1 sm:$0xff]  ;;  %168 = vst [vmem:[#allocation1 + $0x28] sm:$0xff] %v167_v24  ;;  %196 = vst [vmem:[#allocation1 + $0x38] sm:$0xff] %v195_v25  ;;  %v223_v35 = vrot.slane %v222_v26, 1 }
   0xd   :  { %v126_v36 = vrot.slane %v125_v34, 1  ;;  %v130_v37 = vld [vmem:[#allocation0 + $0x2f] ss:$-1 sm:$0xff]  ;;  %v143_v38 = vld [vmem:[#allocation0 + $0x27] ss:$-1 sm:$0xff]  ;;  %v251_v39 = vrot.slane %v250_v27, 1 }
   0xe   :  { %99 = vst [vmem:[#allocation1] sm:$0xff] %v98_v31  ;;  %120 = vst.msk [vmem:[#allocation1 + $0x8] sm:$0xff] %vm106_vm0, %v116_v33  ;;  %v131_v40 = vrot.slane %v130_v37, 1  ;;  %v144_v41 = vrot.slane %v143_v38, 1  ;;  %v153_v42 = vld [vmem:[#allocation0 + $0x3f] ss:$-1 sm:$0xff] }
   0xf   :  { %v158_v43 = vld [vmem:[#allocation0 + $0x47] ss:$-1 sm:$0xff]  ;;  %224 = vst [vmem:[#allocation1 + $0x48] sm:$0xff] %v223_v35  ;;  %107 = vst.msk [vmem:[#allocation1] sm:$0xff] %vm106_vm0, %v103_v32  ;;  %v154_v44 = vrot.slane %v153_v42, 1 }
  0x10   :  { %127 = vst [vmem:[#allocation1 + $0x10] sm:$0xff] %v126_v36  ;;  %v159_v45 = vrot.slane %v158_v43, 1  ;;  %v171_v46 = vld [vmem:[#allocation0 + $0x3f] ss:$-1 sm:$0xff]  ;;  %v181_v47 = vld [vmem:[#allocation0 + $0x57] ss:$-1 sm:$0xff] }
  0x11   :  { %252 = vst [vmem:[#allocation1 + $0x58] sm:$0xff] %v251_v39  ;;  %135 = vst.msk [vmem:[#allocation1 + $0x10] sm:$0xff] %vm106_vm0, %v131_v40  ;;  %v172_v48 = vrot.slane %v171_v46, 1  ;;  %v182_v49 = vrot.slane %v181_v47, 1  ;;  %v186_v50 = vld [vmem:[#allocation0 + $0x5f] ss:$-1 sm:$0xff] }
  0x12   :  { %148 = vst.msk [vmem:[#allocation1 + $0x18] sm:$0xff] %vm106_vm0, %v144_v41  ;;  %v199_v51 = vld [vmem:[#allocation0 + $0x57] ss:$-1 sm:$0xff]  ;;  %155 = vst [vmem:[#allocation1 + $0x20] sm:$0xff] %v154_v44  ;;  %v187_v52 = vrot.slane %v186_v50, 1 }
  0x13   :  { %v200_v53 = vrot.slane %v199_v51, 1  ;;  %v209_v54 = vld [vmem:[#allocation0 + $0x6f] ss:$-1 sm:$0xff]  ;;  %v214_v55 = vld [vmem:[#allocation0 + $0x77] ss:$-1 sm:$0xff]  ;;  %163 = vst.msk [vmem:[#allocation1 + $0x20] sm:$0xff] %vm106_vm0, %v159_v45 }
  0x14   :  { %176 = vst.msk [vmem:[#allocation1 + $0x28] sm:$0xff] %vm106_vm0, %v172_v48  ;;  %183 = vst [vmem:[#allocation1 + $0x30] sm:$0xff] %v182_v49  ;;  %v210_v56 = vrot.slane %v209_v54, 1  ;;  %v215_v57 = vrot.slane %v214_v55, 1  ;;  %v227_v58 = vld [vmem:[#allocation0 + $0x6f] ss:$-1 sm:$0xff] }
  0x15   :  { %v237_v59 = vld [vmem:[#allocation0 + $0x87] ss:$-1 sm:$0xff]  ;;  %191 = vst.msk [vmem:[#allocation1 + $0x30] sm:$0xff] %vm106_vm0, %v187_v52  ;;  %204 = vst.msk [vmem:[#allocation1 + $0x38] sm:$0xff] %vm106_vm0, %v200_v53  ;;  %v228_v60 = vrot.slane %v227_v58, 1  ;;  %v376_v20 = vld [vmem:[#allocation1 + $0x8] sm:$0xff] }
  0x16   :  { %v238_v61 = vrot.slane %v237_v59, 1  ;;  %v242_v62 = vld [vmem:[#allocation0 + $0x8f] ss:$-1 sm:$0xff]  ;;  %v255_v63 = vld [vmem:[#allocation0 + $0x87] ss:$-1 sm:$0xff]  ;;  %211 = vst [vmem:[#allocation1 + $0x40] sm:$0xff] %v210_v56 }
  0x17   :  { %v243_v0 = vrot.slane %v242_v62, 1  ;;  %v256_v1 = vrot.slane %v255_v63, 1  ;;  %v265_v2 = vld [vmem:[#allocation0 + $0x9f] ss:$-1 sm:$0xff]  ;;  %v270_v3 = vld [vmem:[#allocation0 + $0xa7] ss:$-1 sm:$0xff] }
  0x18   :  { %219 = vst.msk [vmem:[#allocation1 + $0x40] sm:$0xff] %vm106_vm0, %v215_v57  ;;  %232 = vst.msk [vmem:[#allocation1 + $0x48] sm:$0xff] %vm106_vm0, %v228_v60  ;;  %v266_v4 = vrot.slane %v265_v2, 1  ;;  %v271_v5 = vrot.slane %v270_v3, 1  ;;  %v278_v6 = vld [vmem:[#allocation0 + $0x97] ss:$-1 sm:$0xff] }
  0x19   :  { %239 = vst [vmem:[#allocation1 + $0x50] sm:$0xff] %v238_v61  ;;  %v283_v7 = vld [vmem:[#allocation0 + $0x9f] ss:$-1 sm:$0xff]  ;;  %260 = vst.msk [vmem:[#allocation1 + $0x58] sm:$0xff] %vm106_vm0, %v256_v1  ;;  %v279_v8 = vrot.slane %v278_v6, 1  ;;  %v374_v19 = vld [vmem:[#allocation1] sm:$0xff] }
  0x1a   :  { %247 = vst.msk [vmem:[#allocation1 + $0x50] sm:$0xff] %vm106_vm0, %v243_v0  ;;  %v284_v9 = vrot.slane %v283_v7, 1  ;;  %v293_v11 = vld [vmem:[#allocation0 + $0xb7] ss:$-1 sm:$0xff]  ;;  %v298_v12 = vld [vmem:[#allocation0 + $0xbf] ss:$-1 sm:$0xff]  ;;  %375 = vst [vmem:[%s618_s1] sm:$0xff] %v374_v19 }
  0x1b   :  { %267 = vst [vmem:[#allocation1 + $0x60] sm:$0xff] %v266_v4  ;;  %v294_v13 = vrot.slane %v293_v11, 1  ;;  %v299_v14 = vrot.slane %v298_v12, 1  ;;  %v306_v15 = vld [vmem:[#allocation0 + $0xaf] ss:$-1 sm:$0xff]  ;;  %280 = vst [vmem:[#allocation1 + $0x68] sm:$0xff] %v279_v8 }
  0x1c   :  { %v311_v16 = vld [vmem:[#allocation0 + $0xb7] ss:$-1 sm:$0xff]  ;;  %275 = vst.msk [vmem:[#allocation1 + $0x60] sm:$0xff] %vm106_vm0, %v271_v5  ;;  %v307_v17 = vrot.slane %v306_v15, 1  ;;  %288 = vst.msk [vmem:[#allocation1 + $0x68] sm:$0xff] %vm106_vm0, %v284_v9  ;;  %v380_v22 = vld [vmem:[#allocation1 + $0x18] sm:$0xff] }
  0x1d   :  { %v312_v18 = vrot.slane %v311_v16, 1  ;;  %v378_v21 = vld [vmem:[#allocation1 + $0x10] sm:$0xff]  ;;  %295 = vst [vmem:[#allocation1 + $0x70] sm:$0xff] %v294_v13  ;;  %377 = vst [vmem:[%s618_s1 + $0x8] sm:$0xff] %v376_v20  ;;  %v382_v23 = vld [vmem:[#allocation1 + $0x20] sm:$0xff] }
  0x1e   :  { %379 = vst [vmem:[%s618_s1 + $0x10] sm:$0xff] %v378_v21  ;;  %v384_v24 = vld [vmem:[#allocation1 + $0x28] sm:$0xff]  ;;  %303 = vst.msk [vmem:[#allocation1 + $0x70] sm:$0xff] %vm106_vm0, %v299_v14  ;;  %v386_v25 = vld [vmem:[#allocation1 + $0x30] sm:$0xff] }
  0x1f   :  { %308 = vst [vmem:[#allocation1 + $0x78] sm:$0xff] %v307_v17  ;;  %381 = vst [vmem:[%s618_s1 + $0x18] sm:$0xff] %v380_v22  ;;  %v388_v26 = vld [vmem:[#allocation1 + $0x38] sm:$0xff]  ;;  %v390_v10 = vld [vmem:[#allocation1 + $0x40] sm:$0xff] }
  0x20   :  { %383 = vst [vmem:[%s618_s1 + $0x20] sm:$0xff] %v382_v23  ;;  %385 = vst [vmem:[%s618_s1 + $0x28] sm:$0xff] %v384_v24  ;;  %v392_v27 = vld [vmem:[#allocation1 + $0x48] sm:$0xff]  ;;  %v396_v29 = vld [vmem:[#allocation1 + $0x58] sm:$0xff] }
  0x21   :  { %316 = vst.msk [vmem:[#allocation1 + $0x78] sm:$0xff] %vm106_vm0, %v312_v18  ;;  %387 = vst [vmem:[%s618_s1 + $0x30] sm:$0xff] %v386_v25  ;;  %v394_v28 = vld [vmem:[#allocation1 + $0x50] sm:$0xff] }
  0x22   :  { %389 = vst [vmem:[%s618_s1 + $0x38] sm:$0xff] %v388_v26  ;;  %391 = vst [vmem:[%s618_s1 + $0x40] sm:$0xff] %v390_v10 }
  0x23   :  { %393 = vst [vmem:[%s618_s1 + $0x48] sm:$0xff] %v392_v27  ;;  %395 = vst [vmem:[%s618_s1 + $0x50] sm:$0xff] %v394_v28  ;;  %v398_v30 = vld [vmem:[#allocation1 + $0x60] sm:$0xff]  ;;  %v400_v31 = vld [vmem:[#allocation1 + $0x68] sm:$0xff] }
  0x24   :  { %397 = vst [vmem:[%s618_s1 + $0x58] sm:$0xff] %v396_v29  ;;  %399 = vst [vmem:[%s618_s1 + $0x60] sm:$0xff] %v398_v30 }
  0x25   :  { %401 = vst [vmem:[%s618_s1 + $0x68] sm:$0xff] %v400_v31  ;;  %v402_v32 = vld [vmem:[#allocation1 + $0x70] sm:$0xff] }
  0x26   :  { %403 = vst [vmem:[%s618_s1 + $0x70] sm:$0xff] %v402_v32 }
  0x28   :  { %v404_v33 = vld [vmem:[#allocation1 + $0x78] sm:$0xff] }
  0x29   :  { %405 = vst [vmem:[%s618_s1 + $0x78] sm:$0xff] %v404_v33 }

</bundles_post_ra>
